<compile_context>
chip_gen: v7x
topology: tpu7x:2x2x1
jax: 0.10.0
libtpu: 0.0.40
codegen_flags: <defaults>
</compile_context>

<pallas_src>
import functools

import jax
import jax.numpy as jnp
from jax.experimental import pallas as pl
from jax.experimental.pallas import tpu as pltpu


def _mlp_kernel(num_layers, x_ref, *refs):
    """refs = (w0, b0, w1, b1, ..., w_fc, b_fc, out_ref).

    x_ref:   (TILE_B, 2E)   bf16
    w_l:     (in_l, out_l)  bf16     b_l:  (1, out_l) f32
    w_fc:    (mlp_dim, 1)   f32      b_fc: (1, 1)     f32
    out_ref: (1, TILE_B)    f32   -- batch on the lane axis (lane-dense store)
    """
    out_ref = refs[-1]
    params = refs[:-1]

    h = x_ref[...]                                  # bf16 (TILE_B, 2E)
    acc = None
    for l in range(num_layers):
        w = params[2 * l][...]                      # bf16 (in, out)
        b = params[2 * l + 1][...]                  # f32  (1, out)
        acc = jnp.dot(h, w, preferred_element_type=jnp.float32) + b   # MXU, f32 acc
        acc = jnp.maximum(acc, 0.0)                 # ReLU in f32 (VPU)
        h = acc.astype(jnp.bfloat16)                # bf16 into next MXU matmul

    # Final fc has output width 1: avoid an MXU matmul with N=1.
    # VPU multiply + cross-sublane reduce, result emitted lane-dense (1, TILE_B).
    w_fc = params[2 * num_layers][...]              # f32 (mlp_dim, 1)
    b_fc = params[2 * num_layers + 1][...]          # f32 (1, 1)
    ht = acc.T                                      # f32 (mlp_dim, TILE_B), XLU transpose
    logit = jnp.sum(ht * w_fc, axis=0, keepdims=True) + b_fc   # (1, TILE_B)
    out_ref[...] = jax.nn.sigmoid(logit).astype(out_ref.dtype)


def mlp_forward_pallas(x, weights, biases, num_layers, *, tile_b=256):
    """x: [B, 2*E] float. weights/biases: lists of (num_layers + 1) arrays.

    Returns [B, 1] float32 probabilities.
    """
    batch, in_dim = x.shape
    n_tiles = pl.cdiv(batch, tile_b)
    b_pad = n_tiles * tile_b

    # bf16 operands into the MXU (halves DMA bytes); biases / fc stay f32.
    x_bf16 = x.astype(jnp.bfloat16)
    if b_pad != batch:
        x_bf16 = jnp.pad(x_bf16, ((0, b_pad - batch), (0, 0)))

    operands = [x_bf16]
    in_specs = [pl.BlockSpec((tile_b, in_dim), lambda i: (i, 0))]
    for l in range(num_layers):
        w = weights[l].astype(jnp.bfloat16)
        b = biases[l].astype(jnp.float32)
        operands += [w, b]
        in_specs += [pl.BlockSpec(w.shape, lambda i: (0, 0)),     # resident across grid
                     pl.BlockSpec(b.shape, lambda i: (0, 0))]
    w_fc = weights[num_layers].astype(jnp.float32)                # tiny, keep f32
    b_fc = biases[num_layers].astype(jnp.float32)
    operands += [w_fc, b_fc]
    in_specs += [pl.BlockSpec(w_fc.shape, lambda i: (0, 0)),
                 pl.BlockSpec(b_fc.shape, lambda i: (0, 0))]

    # Lane-dense output: logits live as a (1, B_pad) row, block (1, TILE_B).
    out_spec = pl.BlockSpec((1, tile_b), lambda i: (0, i))

    kernel = functools.partial(_mlp_kernel, num_layers)

    out_row = pl.pallas_call(
        kernel,
        out_shape=jax.ShapeDtypeStruct((1, b_pad), jnp.float32),
        grid=(n_tiles,),
        in_specs=in_specs,
        out_specs=out_spec,
        compiler_params=pltpu.CompilerParams(
            dimension_semantics=("parallel",),        # megacore-shard the batch on v7x
            vmem_limit_bytes=32 * 1024 * 1024),
    )(*operands)

    return out_row[0, :batch].reshape(batch, 1)


def mlp_forward_ref(x, weights, biases, num_layers, *, bf16=True):
    """Pure-JAX reference. bf16=True mirrors the kernel's mixed precision."""
    if bf16:
        cast = lambda a: a.astype(jnp.bfloat16)
    else:
        cast = lambda a: a.astype(jnp.float32)
    h = cast(x)
    acc = None
    for l in range(num_layers):
        acc = jnp.dot(h, cast(weights[l]), preferred_element_type=jnp.float32)
        acc = jnp.maximum(acc + biases[l].astype(jnp.float32), 0.0)
        h = cast(acc)
    logits = jnp.dot(acc, weights[num_layers].astype(jnp.float32),
                     preferred_element_type=jnp.float32) + biases[num_layers]
    return jax.nn.sigmoid(logits)


if __name__ == "__main__":
    # Model hyper-parameters (small, consistent with the PyTorch module)
    n_user, n_item = 10, 15
    mlp_dim = 32          # latent_dim
    num_layers = 3
    batch = 8

    emb_dim = mlp_dim * 2 ** (num_layers - 1)   # 128

    key = jax.random.PRNGKey(0)
    keys = jax.random.split(key, 4 + 2 * (num_layers + 1))
    k_idx = 0

    # Embedding tables (PyTorch nn.Embedding default: N(0, 1))
    u_table = jax.random.normal(keys[k_idx], (n_user, emb_dim), jnp.float32); k_idx += 1
    i_table = jax.random.normal(keys[k_idx], (n_item, emb_dim), jnp.float32); k_idx += 1

    # MLP layer weights (stored as [in, out] = PyTorch weight.T), uniform(-k, k)
    weights, biases = [], []
    for layer in range(num_layers):
        in_dim = mlp_dim * 2 ** (num_layers - layer)
        out_dim = in_dim // 2
        bound = 1.0 / (in_dim ** 0.5)
        w = jax.random.uniform(keys[k_idx], (in_dim, out_dim), jnp.float32,
                               -bound, bound); k_idx += 1
        b = jax.random.uniform(keys[k_idx], (1, out_dim), jnp.float32,
                               -bound, bound); k_idx += 1
        weights.append(w)
        biases.append(b)

    # Final fc layer: latent_dim -> 1
    bound = 1.0 / (mlp_dim ** 0.5)
    w_fc = jax.random.uniform(keys[k_idx], (mlp_dim, 1), jnp.float32,
                              -bound, bound); k_idx += 1
    b_fc = jax.random.uniform(keys[k_idx], (1, 1), jnp.float32,
                              -bound, bound); k_idx += 1
    weights.append(w_fc)
    biases.append(b_fc)

    # Inputs: user/item indices
    ku, ki = jax.random.split(jax.random.PRNGKey(42))
    u = jax.random.randint(ku, (batch,), 0, n_user, jnp.int32)
    i = jax.random.randint(ki, (batch,), 0, n_item, jnp.int32)

    # Glue: embedding gather + concat (feature axis last)
    user_emb = jnp.take(u_table, u, axis=0)              # [B, E]
    item_emb = jnp.take(i_table, i, axis=0)              # [B, E]
    x = jnp.concatenate([user_emb, item_emb], axis=-1)   # [B, 2*E]

    out = mlp_forward_pallas(x, weights, biases, num_layers)
    out = jax.block_until_ready(out)

    ref_mixed = mlp_forward_ref(x, weights, biases, num_layers, bf16=True)
    ref_f32 = mlp_forward_ref(x, weights, biases, num_layers, bf16=False)

    assert out.shape == (batch, 1)
    assert jnp.allclose(out, ref_mixed, atol=1e-3, rtol=1e-3), "mismatch vs bf16 reference"
    assert jnp.allclose(out, ref_f32, atol=3e-2, rtol=3e-2), "mismatch vs f32 reference"

    print("KERNEL_OK")
</pallas_src>

<mosaic_0001>
module attributes {stable_mosaic.version = 11 : i64} {
  func.func @_mlp_kernel(%arg0: i32, %arg1: memref<256x256xbf16, #tpu.memory_space<vmem>>, %arg2: memref<256x128xbf16, #tpu.memory_space<vmem>>, %arg3: memref<1x128xf32, #tpu.memory_space<vmem>>, %arg4: memref<128x64xbf16, #tpu.memory_space<vmem>>, %arg5: memref<1x64xf32, #tpu.memory_space<vmem>>, %arg6: memref<64x32xbf16, #tpu.memory_space<vmem>>, %arg7: memref<1x32xf32, #tpu.memory_space<vmem>>, %arg8: memref<32x1xf32, #tpu.memory_space<vmem>>, %arg9: memref<1x1xf32, #tpu.memory_space<vmem>>, %arg10: memref<1x256xf32, #tpu.memory_space<vmem>>) attributes {dimension_semantics = [#tpu.dimension_semantics<parallel>], iteration_bounds = array<i64: 1>, scalar_prefetch = 0 : i64, scratch_operands = 0 : i64, tpu.core_type = #tpu.core_type<tc>, window_params = [{transform_indices = @transform_0, window_bounds = array<i64: 256, 256>}, {pipeline_mode = #tpu.pipeline_mode<synchronous>, transform_indices = @transform_1, window_bounds = array<i64: 256, 128>}, {pipeline_mode = #tpu.pipeline_mode<synchronous>, transform_indices = @transform_2, window_bounds = array<i64: 1, 128>}, {pipeline_mode = #tpu.pipeline_mode<synchronous>, transform_indices = @transform_3, window_bounds = array<i64: 128, 64>}, {pipeline_mode = #tpu.pipeline_mode<synchronous>, transform_indices = @transform_4, window_bounds = array<i64: 1, 64>}, {pipeline_mode = #tpu.pipeline_mode<synchronous>, transform_indices = @transform_5, window_bounds = array<i64: 64, 32>}, {pipeline_mode = #tpu.pipeline_mode<synchronous>, transform_indices = @transform_6, window_bounds = array<i64: 1, 32>}, {pipeline_mode = #tpu.pipeline_mode<synchronous>, transform_indices = @transform_7, window_bounds = array<i64: 32, 1>}, {pipeline_mode = #tpu.pipeline_mode<synchronous>, transform_indices = @transform_8, window_bounds = array<i64: 1, 1>}, {transform_indices = @transform_9, window_bounds = array<i64: 1, 256>}]} {
    %c0 = arith.constant 0 : index
    %c0_0 = arith.constant 0 : index
    %0 = vector.load %arg1[%c0, %c0_0] : memref<256x256xbf16, #tpu.memory_space<vmem>>, vector<256x256xbf16>
    %c0_1 = arith.constant 0 : index
    %c0_2 = arith.constant 0 : index
    %1 = vector.load %arg2[%c0_1, %c0_2] : memref<256x128xbf16, #tpu.memory_space<vmem>>, vector<256x128xbf16>
    %c0_3 = arith.constant 0 : index
    %c0_4 = arith.constant 0 : index
    %2 = vector.load %arg3[%c0_3, %c0_4] : memref<1x128xf32, #tpu.memory_space<vmem>>, vector<1x128xf32>
    %cst = arith.constant dense<0.000000e+00> : vector<256x128xf32>
    %3 = tpu.matmul %0, %1, %cst {dimension_numbers = #tpu.dot_dimension_numbers<[1], [0], [0], [1], [0, 0, 1, 1], [], []>} : vector<256x256xbf16>, vector<256x128xbf16>, vector<256x128xf32> -> vector<256x128xf32>
    %4 = vector.broadcast %2 : vector<1x128xf32> to vector<256x128xf32>
    %5 = arith.addf %3, %4 : vector<256x128xf32>
    %cst_5 = arith.constant 0.000000e+00 : f32
    %6 = vector.broadcast %cst_5 : f32 to vector<256x128xf32>
    %7 = arith.maximumf %5, %6 : vector<256x128xf32>
    %8 = arith.truncf %7 : vector<256x128xf32> to vector<256x128xbf16>
    %c0_6 = arith.constant 0 : index
    %c0_7 = arith.constant 0 : index
    %9 = vector.load %arg4[%c0_6, %c0_7] : memref<128x64xbf16, #tpu.memory_space<vmem>>, vector<128x64xbf16>
    %c0_8 = arith.constant 0 : index
    %c0_9 = arith.constant 0 : index
    %10 = vector.load %arg5[%c0_8, %c0_9] : memref<1x64xf32, #tpu.memory_space<vmem>>, vector<1x64xf32>
    %cst_10 = arith.constant dense<0.000000e+00> : vector<256x64xf32>
    %11 = tpu.matmul %8, %9, %cst_10 {dimension_numbers = #tpu.dot_dimension_numbers<[1], [0], [0], [1], [0, 0, 1, 1], [], []>} : vector<256x128xbf16>, vector<128x64xbf16>, vector<256x64xf32> -> vector<256x64xf32>
    %12 = vector.broadcast %10 : vector<1x64xf32> to vector<256x64xf32>
    %13 = arith.addf %11, %12 : vector<256x64xf32>
    %cst_11 = arith.constant 0.000000e+00 : f32
    %14 = vector.broadcast %cst_11 : f32 to vector<256x64xf32>
    %15 = arith.maximumf %13, %14 : vector<256x64xf32>
    %16 = arith.truncf %15 : vector<256x64xf32> to vector<256x64xbf16>
    %c0_12 = arith.constant 0 : index
    %c0_13 = arith.constant 0 : index
    %17 = vector.load %arg6[%c0_12, %c0_13] : memref<64x32xbf16, #tpu.memory_space<vmem>>, vector<64x32xbf16>
    %c0_14 = arith.constant 0 : index
    %c0_15 = arith.constant 0 : index
    %18 = vector.load %arg7[%c0_14, %c0_15] : memref<1x32xf32, #tpu.memory_space<vmem>>, vector<1x32xf32>
    %cst_16 = arith.constant dense<0.000000e+00> : vector<256x32xf32>
    %19 = tpu.matmul %16, %17, %cst_16 {dimension_numbers = #tpu.dot_dimension_numbers<[1], [0], [0], [1], [0, 0, 1, 1], [], []>} : vector<256x64xbf16>, vector<64x32xbf16>, vector<256x32xf32> -> vector<256x32xf32>
    %20 = vector.broadcast %18 : vector<1x32xf32> to vector<256x32xf32>
    %21 = arith.addf %19, %20 : vector<256x32xf32>
    %cst_17 = arith.constant 0.000000e+00 : f32
    %22 = vector.broadcast %cst_17 : f32 to vector<256x32xf32>
    %23 = arith.maximumf %21, %22 : vector<256x32xf32>
    %c0_18 = arith.constant 0 : index
    %c0_19 = arith.constant 0 : index
    %24 = vector.load %arg8[%c0_18, %c0_19] : memref<32x1xf32, #tpu.memory_space<vmem>>, vector<32x1xf32>
    %c0_20 = arith.constant 0 : index
    %c0_21 = arith.constant 0 : index
    %25 = vector.load %arg9[%c0_20, %c0_21] : memref<1x1xf32, #tpu.memory_space<vmem>>, vector<1x1xf32>
    %26 = tpu.transpose %23, [1, 0] : vector<256x32xf32> -> vector<32x256xf32>
    %27 = vector.broadcast %24 : vector<32x1xf32> to vector<32x256xf32>
    %28 = arith.mulf %26, %27 : vector<32x256xf32>
    %cst_22 = arith.constant dense<0.000000e+00> : vector<256xf32>
    %29 = vector.multi_reduction <add>, %28, %cst_22 [0] : vector<32x256xf32> to vector<256xf32>
    %30 = vector.shape_cast %29 : vector<256xf32> to vector<1x256xf32>
    %31 = vector.broadcast %25 : vector<1x1xf32> to vector<1x256xf32>
    %32 = arith.addf %30, %31 : vector<1x256xf32>
    %33 = arith.negf %32 : vector<1x256xf32>
    %34 = math.exp %33 : vector<1x256xf32>
    %cst_23 = arith.constant 1.000000e+00 : f32
    %35 = vector.broadcast %cst_23 : f32 to vector<1x256xf32>
    %36 = arith.addf %35, %34 : vector<1x256xf32>
    %37 = arith.divf %35, %36 : vector<1x256xf32>
    %c0_24 = arith.constant 0 : index
    %c0_25 = arith.constant 0 : index
    %38 = vector.load %arg10[%c0_24, %c0_25] : memref<1x256xf32, #tpu.memory_space<vmem>>, vector<1x256xf32>
    tpu.vector_store %arg10[%c0_24, %c0_25], %37 {strides = array<i32>} : memref<1x256xf32, #tpu.memory_space<vmem>>, vector<1x256xf32>,
    return
  }
  func.func @transform_0(%arg0: i32) -> (i32, i32) {
    %c0_i32 = arith.constant 0 : i32
    %c0_i32_0 = arith.constant 0 : i32
    return %arg0, %c0_i32 : i32, i32
  }
  func.func @transform_1(%arg0: i32) -> (i32, i32) {
    %c0_i32 = arith.constant 0 : i32
    %c0_i32_0 = arith.constant 0 : i32
    %c0_i32_1 = arith.constant 0 : i32
    return %c0_i32, %c0_i32_0 : i32, i32
  }
  func.func @transform_2(%arg0: i32) -> (i32, i32) {
    %c0_i32 = arith.constant 0 : i32
    %c0_i32_0 = arith.constant 0 : i32
    %c0_i32_1 = arith.constant 0 : i32
    return %c0_i32, %c0_i32_0 : i32, i32
  }
  func.func @transform_3(%arg0: i32) -> (i32, i32) {
    %c0_i32 = arith.constant 0 : i32
    %c0_i32_0 = arith.constant 0 : i32
    %c0_i32_1 = arith.constant 0 : i32
    return %c0_i32, %c0_i32_0 : i32, i32
  }
  func.func @transform_4(%arg0: i32) -> (i32, i32) {
    %c0_i32 = arith.constant 0 : i32
    %c0_i32_0 = arith.constant 0 : i32
    %c0_i32_1 = arith.constant 0 : i32
    return %c0_i32, %c0_i32_0 : i32, i32
  }
  func.func @transform_5(%arg0: i32) -> (i32, i32) {
    %c0_i32 = arith.constant 0 : i32
    %c0_i32_0 = arith.constant 0 : i32
    %c0_i32_1 = arith.constant 0 : i32
    return %c0_i32, %c0_i32_0 : i32, i32
  }
  func.func @transform_6(%arg0: i32) -> (i32, i32) {
    %c0_i32 = arith.constant 0 : i32
    %c0_i32_0 = arith.constant 0 : i32
    %c0_i32_1 = arith.constant 0 : i32
    return %c0_i32, %c0_i32_0 : i32, i32
  }
  func.func @transform_7(%arg0: i32) -> (i32, i32) {
    %c0_i32 = arith.constant 0 : i32
    %c0_i32_0 = arith.constant 0 : i32
    %c0_i32_1 = arith.constant 0 : i32
    return %c0_i32, %c0_i32_0 : i32, i32
  }
  func.func @transform_8(%arg0: i32) -> (i32, i32) {
    %c0_i32 = arith.constant 0 : i32
    %c0_i32_0 = arith.constant 0 : i32
    %c0_i32_1 = arith.constant 0 : i32
    return %c0_i32, %c0_i32_0 : i32, i32
  }
  func.func @transform_9(%arg0: i32) -> (i32, i32) {
    %c0_i32 = arith.constant 0 : i32
    %c0_i32_0 = arith.constant 0 : i32
    return %c0_i32, %arg0 : i32, i32
  }
}

</mosaic_0001>

<bundles_post_ra>
// kernel: tpu_custom_call.1
= control target key start
LH: loop header
LB: loop body
LE: loop exit
PB: predicated region body
PF: predicated region fallthrough
CT: control target
= control target key end

     0   :  { %s2094_s0 = inlined_call_operand.hbm [shape: bf16[256,256], index: 0, kind: input, shape index: {}]   ;;  %s2095_s1 = inlined_call_operand.vmem [shape: bf16[256,128], index: 1, kind: input, shape index: {}]   ;;  %s2096_s2 = inlined_call_operand.vmem [shape: f32[1,128], index: 2, kind: input, shape index: {}]   ;;  %s2097_s3 = inlined_call_operand.vmem [shape: bf16[128,64], index: 3, kind: input, shape index: {}]   ;;  %s2098_s4 = inlined_call_operand.vmem [shape: f32[1,64], index: 4, kind: input, shape index: {}]   ;;  %s2099_s5 = inlined_call_operand.vmem [shape: bf16[64,32], index: 5, kind: input, shape index: {}]   ;;  %s2100_s6 = inlined_call_operand.vmem [shape: f32[1,32], index: 6, kind: input, shape index: {}]   ;;  %s2101_s7 = inlined_call_operand.vmem [shape: f32[32,1], index: 7, kind: input, shape index: {}]   ;;  %s2102_s8 = inlined_call_operand.<no memory space> [shape: f32[1,1], index: 8, kind: input, shape index: {}]   ;;  %s2103_s9 = inlined_call_operand.hbm [shape: f32[1,256], index: 9, kind: output, shape index: {}]  }
   0x1   :  { %v14_v0 = vstv %s2102_s8 }
   0x2   :  { %15 = vst [vmem:[#allocation2] sm:$0x1] %v14_v0 }
   0x3   :  { %16 = vsyncpa [#allocation4], 0 }
   0x4   :  { %17 = vsyncpa [#allocation5], 0  ;;  %s1788_s11 = smov [#allocation3]   ;;  %s1740_s15 = scalar_lea.hbm %s2094_s0, 4096 }
   0x5   :  { %s23_s12 = sshll.u32 %s1788_s11, 4  ;;  %p1741_p0 = scmp.ne.s32.totalorder %s2094_s0, %s1740_s15  ;;  %s24_s12 = int_to_ptr.vmem [resolvable:$true] %s23_s12 }
   0x6   :  { %p1744_p1 = scmp.lt.u32.totalorder %s1740_s15, %s2094_s0 }
   0x8   :  { %p1746_p2 = pnand %p1744_p1, %p1741_p0 }
   0xa   :  { %1749 = shalt.err (!%p1746_p2)
}
   0xb   :  { %s1750_s8 = scalar_lea.vmem %s24_s12, 4096  ;;  %p1755_p4 = scmp.lt.s32.totalorder %s24_s12, %s24_s12 }
   0xc   :  { %p1751_p3 = scmp.ne.s32.totalorder %s24_s12, %s1750_s8  ;;  %p1756_p5 = scmp.lt.s32.totalorder %s1750_s8, %s1750_s8 }
   0xe   :  { %p1757_p6 = por %p1756_p5, %p1755_p4 }
  0x10   :  { %p1758_p7 = pnand %p1757_p6, %p1751_p3 }
  0x12   :  { %1761 = shalt.err (!%p1758_p7)
}
  0x13   :  { %s1789_s20 = smov 128   ;;  %s1790_s21 = smov 8  }
  0x14   :  { %29 = dma.hbm_to_vmem [thread:$0]  %s2094_s0, 4096, %s24_s12, [#allocation4], %s1789_s20, %s1789_s20, %s1790_s21  }
  0x15   :  { %1784 = dma.done.wait [#allocation4], 4096  }
  0x16   :  { %1785 = vsyncadd [#allocation4], 4294963200  ;;  %v1656_v1 = vld [vmem:[%s2095_s1 + $0x40] sm:$0xff]   ;;  %v1658_v3 = vld [vmem:[%s2095_s1 + $0x48] sm:$0xff]   ;;  %vm905_vm0 = vcmask 523264  }
  0x17   :  { %v1657_v2 = vld [vmem:[%s2095_s1] sm:$0xff]   ;;  %1404 = vmatprep.subr.bf16.mxu0 %v1656_v1  ;;  %v1659_v4 = vld [vmem:[%s2095_s1 + $0x8] sm:$0xff]   ;;  %v1660_v5 = vld [vmem:[%s2095_s1 + $0x50] sm:$0xff]  }
  0x18   :  { %1405 = vmatpush3.bf16.msra.mxu0 %v1657_v2  ;;  %v1661_v6 = vld [vmem:[%s2095_s1 + $0x10] sm:$0xff]   ;;  %v1662_v7 = vld [vmem:[%s2095_s1 + $0x58] sm:$0xff]   ;;  %v1664_v9 = vld [vmem:[%s2095_s1 + $0x60] sm:$0xff]  }
  0x19   :  { %1406 = vmatprep.subr.bf16.mxu0 %v1658_v3  ;;  %v1663_v8 = vld [vmem:[%s2095_s1 + $0x18] sm:$0xff]   ;;  %v1665_v10 = vld [vmem:[%s2095_s1 + $0x20] sm:$0xff]   ;;  %v1666_v11 = vld [vmem:[%s2095_s1 + $0x68] sm:$0xff]  }
  0x1a   :  { %v1674_v12 = vld [vmem:[#allocation3 + $0x4] ss:$8 sps:$4 sm:$0xff]   ;;  %v1670_v16 = vld [vmem:[%s2095_s1 + $0x78] sm:$0xff]   ;;  %v1672_v18 = vld [vmem:[#allocation3] ss:$8 sps:$4 sm:$0xff]  }
  0x1b   :  { %v1667_v13 = vld [vmem:[%s2095_s1 + $0x28] sm:$0xff]   ;;  %409 = vmatprep.mubr.bf16.mxu0 %v1674_v12  ;;  %v1668_v14 = vld [vmem:[%s2095_s1 + $0x70] sm:$0xff]   ;;  %v1671_v17 = vld [vmem:[%s2095_s1 + $0x38] sm:$0xff]  }
  0x1c   :  { %1407 = vmatpush3.bf16.msra.mxu0 %v1659_v4  ;;  %v1669_v15 = vld [vmem:[%s2095_s1 + $0x30] sm:$0xff]   ;;  %v1720_v22 = vld [vmem:[%s2097_s3] sm:$0xff]   ;;  %v1721_v23 = vld [vmem:[%s2097_s3 + $0x8] sm:$0xff]  }
  0x1d   :  { %1408 = vmatprep.subr.bf16.mxu0 %v1660_v5  ;;  %v1675_v19 = vld [vmem:[#allocation3 + $0x14] ss:$8 sps:$4 sm:$0xff]   ;;  %v1677_v20 = vld [vmem:[#allocation3 + $0x10] ss:$8 sps:$4 sm:$0xff]   ;;  %v1678_v21 = vld [vmem:[#allocation3 + $0x24] ss:$8 sps:$4 sm:$0xff]   ;;  %1560 = vmatprep.subr.bf16.mxu1 %v1720_v22 }
  0x1e   :  { %v1722_v24 = vld [vmem:[%s2097_s3 + $0x10] sm:$0xff]   ;;  %1561 = vmatpush3.bf16.msra.mxu1 %v1720_v22  ;;  %v1680_v25 = vld [vmem:[#allocation3 + $0x20] ss:$8 sps:$4 sm:$0xff]   ;;  %v1723_v43 = vld [vmem:[%s2097_s3 + $0x18] sm:$0xff]  }
  0x1f   :  { %1562 = vmatprep.subr.bf16.mxu1 %v1721_v23  ;;  %v1681_v26 = vld [vmem:[#allocation3 + $0x34] ss:$8 sps:$4 sm:$0xff]   ;;  %v1683_v27 = vld [vmem:[#allocation3 + $0x30] ss:$8 sps:$4 sm:$0xff]   ;;  %v1684_v28 = vld [vmem:[#allocation3 + $0x44] ss:$8 sps:$4 sm:$0xff]  }
  0x20   :  { %1409 = vmatpush3.bf16.msra.mxu0 %v1661_v6  ;;  %v1686_v29 = vld [vmem:[#allocation3 + $0x40] ss:$8 sps:$4 sm:$0xff]   ;;  %v1687_v30 = vld [vmem:[#allocation3 + $0x54] ss:$8 sps:$4 sm:$0xff]   ;;  %v1689_v31 = vld [vmem:[#allocation3 + $0x50] ss:$8 sps:$4 sm:$0xff]  }
  0x21   :  { %1410 = vmatprep.subr.bf16.mxu0 %v1662_v7  ;;  %v1690_v32 = vld [vmem:[#allocation3 + $0x64] ss:$8 sps:$4 sm:$0xff]   ;;  %v1692_v33 = vld [vmem:[#allocation3 + $0x60] ss:$8 sps:$4 sm:$0xff]   ;;  %v1693_v34 = vld [vmem:[#allocation3 + $0x74] ss:$8 sps:$4 sm:$0xff]  }
  0x22   :  { %1563 = vmatpush3.bf16.msra.mxu1 %v1721_v23  ;;  %v1695_v35 = vld [vmem:[#allocation3 + $0x70] ss:$8 sps:$4 sm:$0xff]   ;;  %v1696_v36 = vld [vmem:[#allocation3 + $0x84] ss:$8 sps:$4 sm:$0xff]   ;;  %v1698_v37 = vld [vmem:[#allocation3 + $0x80] ss:$8 sps:$4 sm:$0xff]  }
  0x23   :  { %1564 = vmatprep.subr.bf16.mxu1 %v1722_v24  ;;  %v1699_v38 = vld [vmem:[#allocation3 + $0x94] ss:$8 sps:$4 sm:$0xff]   ;;  %v1701_v39 = vld [vmem:[#allocation3 + $0x90] ss:$8 sps:$4 sm:$0xff]   ;;  %v1702_v40 = vld [vmem:[#allocation3 + $0xa4] ss:$8 sps:$4 sm:$0xff]  }
  0x24   :  { %1411 = vmatpush3.bf16.msra.mxu0 %v1663_v8  ;;  %v1704_v41 = vld [vmem:[#allocation3 + $0xa0] ss:$8 sps:$4 sm:$0xff]   ;;  %v1705_v42 = vld [vmem:[#allocation3 + $0xb4] ss:$8 sps:$4 sm:$0xff]   ;;  %v1707_v44 = vld [vmem:[#allocation3 + $0xb0] ss:$8 sps:$4 sm:$0xff]  }
  0x25   :  { %1412 = vmatprep.subr.bf16.mxu0 %v1664_v9  ;;  %v1708_v45 = vld [vmem:[#allocation3 + $0xc4] ss:$8 sps:$4 sm:$0xff]   ;;  %v1710_v48 = vld [vmem:[#allocation3 + $0xc0] ss:$8 sps:$4 sm:$0xff]   ;;  %v1711_v49 = vld [vmem:[#allocation3 + $0xd4] ss:$8 sps:$4 sm:$0xff]  }
  0x26   :  { %1565 = vmatpush3.bf16.msra.mxu1 %v1722_v24  ;;  %v1724_v46 = vld [vmem:[%s2097_s3 + $0x20] sm:$0xff]   ;;  %v1725_v47 = vld [vmem:[%s2097_s3 + $0x28] sm:$0xff]   ;;  %v1726_v50 = vld [vmem:[%s2097_s3 + $0x30] sm:$0xff]  }
  0x27   :  { %1566 = vmatprep.subr.bf16.mxu1 %v1723_v43  ;;  %v1727_v51 = vld [vmem:[%s2097_s3 + $0x38] sm:$0xff]   ;;  %v1714_v53 = vld [vmem:[#allocation3 + $0xe4] ss:$8 sps:$4 sm:$0xff]   ;;  %v1716_v54 = vld [vmem:[#allocation3 + $0xe0] ss:$8 sps:$4 sm:$0xff]  }
  0x28   :  { %1413 = vmatpush3.bf16.msra.mxu0 %v1665_v10  ;;  %v1713_v52 = vld [vmem:[#allocation3 + $0xd0] ss:$8 sps:$4 sm:$0xff]   ;;  %v1717_v55 = vld [vmem:[#allocation3 + $0xf4] ss:$8 sps:$4 sm:$0xff]  }
  0x29   :  { %1414 = vmatprep.subr.bf16.mxu0 %v1666_v11  ;;  %v1719_v56 = vld [vmem:[#allocation3 + $0xf0] ss:$8 sps:$4 sm:$0xff]   ;;  %v1934_v59 = vld [vmem:[%s2096_s2] ss:$0 sm:$0xff] }
  0x2a   :  { %1567 = vmatpush3.bf16.msra.mxu1 %v1723_v43  ;;  %v1728_v1 = vld [vmem:[%s2099_s5] sm:$0xff]  }
  0x2b   :  { %1568 = vmatprep.subr.bf16.mxu1 %v1724_v46 }
  0x2c   :  { %1415 = vmatpush3.bf16.msra.mxu0 %v1667_v13 }
  0x2d   :  { %1416 = vmatprep.subr.bf16.mxu0 %v1668_v14 }
  0x2e   :  { %1569 = vmatpush3.bf16.msra.mxu1 %v1724_v46 }
  0x2f   :  { %1570 = vmatprep.subr.bf16.mxu1 %v1725_v47 }
  0x30   :  { %1417 = vmatpush3.bf16.msra.mxu0 %v1669_v15 }
  0x31   :  { %1418 = vmatprep.subr.bf16.mxu0 %v1670_v16 }
  0x32   :  { %1571 = vmatpush3.bf16.msra.mxu1 %v1725_v47 }
  0x33   :  { %1572 = vmatprep.subr.bf16.mxu1 %v1726_v50 }
  0x34   :  { %1419 = vmatpush3.bf16.msra.mxu0 %v1671_v17 }
  0x36   :  { %1573 = vmatpush3.bf16.msra.mxu1 %v1726_v50 }
  0x37   :  { %410 = vmatmul.mubr.bf16.vlgmr.msra.gmra.mrb[0].mxu0 %v1672_v18  ;;  %1574 = vmatprep.subr.bf16.mxu1 %v1727_v51 }
  0x38   :  { %417 = vmatprep.mubr.bf16.mxu0 %v1675_v19 }
  0x3a   :  { %1575 = vmatpush3.bf16.msra.mxu1 %v1727_v51 }
  0x3b   :  { %1608 = vmatprep.subr.bf16.mxu1 %v1728_v1 }
  0x3f   :  { %418 = vmatmul.mubr.bf16.gmra.mrb[4].mxu0 %v1677_v20 }
  0x40   :  { %425 = vmatprep.mubr.bf16.mxu0 %v1678_v21  ;;  %v1729_v21 = vld [vmem:[%s2099_s5 + $0x8] sm:$0xff]  }
  0x47   :  { %426 = vmatmul.mubr.bf16.gmra.mrb[8].mxu0 %v1680_v25 }
  0x48   :  { %433 = vmatprep.mubr.bf16.mxu0 %v1681_v26 }
  0x4f   :  { %434 = vmatmul.mubr.bf16.gmra.mrb[12].mxu0 %v1683_v27 }
  0x50   :  { %441 = vmatprep.mubr.bf16.mxu0 %v1684_v28 }
  0x57   :  { %442 = vmatmul.mubr.bf16.gmra.mrb[16].mxu0 %v1686_v29 }
  0x58   :  { %449 = vmatprep.mubr.bf16.mxu0 %v1687_v30 }
  0x5f   :  { %450 = vmatmul.mubr.bf16.gmra.mrb[20].mxu0 %v1689_v31 }
  0x60   :  { %457 = vmatprep.mubr.bf16.mxu0 %v1690_v32 }
  0x67   :  { %458 = vmatmul.mubr.bf16.gmra.mrb[24].mxu0 %v1692_v33 }
  0x68   :  { %465 = vmatprep.mubr.bf16.mxu0 %v1693_v34 }
  0x6f   :  { %466 = vmatmul.mubr.bf16.gmra.mrb[28].mxu0 %v1695_v35 }
  0x70   :  { %473 = vmatprep.mubr.bf16.mxu0 %v1696_v36 }
  0x77   :  { %474 = vmatmul.mubr.bf16.gmra.mrb[32].mxu0 %v1698_v37 }
  0x78   :  { %481 = vmatprep.mubr.bf16.mxu0 %v1699_v38 }
  0x7f   :  { %482 = vmatmul.mubr.bf16.gmra.mrb[36].mxu0 %v1701_v39 }
  0x80   :  { %489 = vmatprep.mubr.bf16.mxu0 %v1702_v40 }
  0x87   :  { %490 = vmatmul.mubr.bf16.gmra.mrb[40].mxu0 %v1704_v41 }
  0x88   :  { %497 = vmatprep.mubr.bf16.mxu0 %v1705_v42 }
  0x8f   :  { %498 = vmatmul.mubr.bf16.gmra.mrb[44].mxu0 %v1707_v44 }
  0x90   :  { %505 = vmatprep.mubr.bf16.mxu0 %v1708_v45 }
  0x97   :  { %506 = vmatmul.mubr.bf16.gmra.mrb[48].mxu0 %v1710_v48 }
  0x98   :  { %513 = vmatprep.mubr.bf16.mxu0 %v1711_v49 }
  0x9f   :  { %514 = vmatmul.mubr.bf16.gmra.mrb[52].mxu0 %v1713_v52 }
  0xa0   :  { %521 = vmatprep.mubr.bf16.mxu0 %v1714_v53 }
  0xa7   :  { %522 = vmatmul.mubr.bf16.gmra.mrb[56].mxu0 %v1716_v54 }
  0xa8   :  { %529 = vmatprep.mubr.bf16.mxu0 %v1717_v55 }
  0xaf   :  { %530 = vmatmul.mubr.bf16.gmra.mrb[60].mxu0 %v1719_v56 }
 0x10a   :  { %v1420_v57 = vpop.f32.mrb[0].mxu0 }
 0x10b   :  { %v1421_v58 = vpop.f32.mrb[1].mxu0 }
 0x10c   :  { %v1422_v60 = vadd.f32 %v1421_v58, %v1420_v57  ;;  %v1423_v61 = vpop.f32.mrb[2].mxu0 }
 0x10d   :  { %v1424_v62 = vpop.f32.mrb[3].mxu0 }
 0x10e   :  { %v1425_v63 = vadd.f32 %v1424_v62, %v1423_v61  ;;  %v412_v0 = vadd.f32 %v1422_v60, %v1934_v59 }
 0x110   :  { %v415_v2 = vadd.f32 %v1425_v63, %v1934_v59  ;;  %v538_v4 = vmax.f32 %v412_v0, 0.0 }
 0x112   :  { %v1426_v3 = vpop.f32.mrb[4].mxu0  ;;  %v539_v5 = vmax.f32 %v415_v2, 0.0 }
 0x113   :  { %v1427_v6 = vpop.f32.mrb[5].mxu0 }
 0x114   :  { %v1428_v7 = vadd.f32 %v1427_v6, %v1426_v3  ;;  %v1429_v8 = vpop.f32.mrb[6].mxu0  ;;  %v570_v9 = vpack.c.bf16 %v539_v5, %v538_v4 }
 0x115   :  { %v1430_v10 = vpop.f32.mrb[7].mxu0 }
 0x116   :  { %v420_v11 = vadd.f32 %v1428_v7, %v1934_v59  ;;  %v1431_v12 = vadd.f32 %v1430_v10, %v1429_v8  ;;  %1576 = vmatprep.mubr.bf16.mxu1 %v570_v9 }
 0x118   :  { %v423_v13 = vadd.f32 %v1431_v12, %v1934_v59  ;;  %v540_v14 = vmax.f32 %v420_v11, 0.0 }
 0x11a   :  { %v541_v15 = vmax.f32 %v423_v13, 0.0  ;;  %v1432_v16 = vpop.f32.mrb[8].mxu0 }
 0x11b   :  { %v1433_v17 = vpop.f32.mrb[9].mxu0 }
 0x11c   :  { %v1434_v18 = vadd.f32 %v1433_v17, %v1432_v16  ;;  %v1435_v19 = vpop.f32.mrb[10].mxu0  ;;  %v571_v20 = vpack.c.bf16 %v541_v15, %v540_v14 }
 0x11d   :  { %v1436_v22 = vpop.f32.mrb[11].mxu0 }
 0x11e   :  { %v428_v23 = vadd.f32 %v1434_v18, %v1934_v59  ;;  %v1437_v24 = vadd.f32 %v1436_v22, %v1435_v19  ;;  %1577 = vmatmul.mubr.bf16.vlgmr.msra.gmra.mrb[0].mxu1 %v571_v20 }
 0x11f   :  { %1609 = vmatpush3.bf16.msra.mxu1 %v1728_v1 }
 0x120   :  { %v431_v25 = vadd.f32 %v1437_v24, %v1934_v59  ;;  %1610 = vmatprep.subr.bf16.mxu1 %v1729_v21  ;;  %v542_v26 = vmax.f32 %v428_v23, 0.0 }
 0x122   :  { %v543_v27 = vmax.f32 %v431_v25, 0.0  ;;  %v1438_v28 = vpop.f32.mrb[12].mxu0 }
 0x123   :  { %v1439_v29 = vpop.f32.mrb[13].mxu0  ;;  %1611 = vmatpush3.bf16.msra.mxu1 %v1729_v21 }
 0x124   :  { %v1440_v30 = vadd.f32 %v1439_v29, %v1438_v28  ;;  %v1441_v31 = vpop.f32.mrb[14].mxu0  ;;  %v572_v32 = vpack.c.bf16 %v543_v27, %v542_v26 }
 0x125   :  { %v1442_v33 = vpop.f32.mrb[15].mxu0 }
 0x126   :  { %v436_v34 = vadd.f32 %v1440_v30, %v1934_v59  ;;  %v1443_v35 = vadd.f32 %v1442_v33, %v1441_v31  ;;  %1580 = vmatprep.mubr.bf16.mxu1 %v572_v32 }
 0x128   :  { %v439_v36 = vadd.f32 %v1443_v35, %v1934_v59  ;;  %v544_v37 = vmax.f32 %v436_v34, 0.0 }
 0x12a   :  { %v545_v38 = vmax.f32 %v439_v36, 0.0  ;;  %v1444_v39 = vpop.f32.mrb[16].mxu0 }
 0x12b   :  { %v1445_v40 = vpop.f32.mrb[17].mxu0 }
 0x12c   :  { %v1446_v41 = vadd.f32 %v1445_v40, %v1444_v39  ;;  %v1447_v42 = vpop.f32.mrb[18].mxu0  ;;  %v573_v43 = vpack.c.bf16 %v545_v38, %v544_v37 }
 0x12d   :  { %v1448_v44 = vpop.f32.mrb[19].mxu0 }
 0x12e   :  { %v444_v45 = vadd.f32 %v1446_v41, %v1934_v59  ;;  %v1449_v46 = vadd.f32 %v1448_v44, %v1447_v42  ;;  %1581 = vmatmul.mubr.bf16.gmra.mrb[4].mxu1 %v573_v43 }
 0x130   :  { %v447_v47 = vadd.f32 %v1449_v46, %v1934_v59  ;;  %v546_v48 = vmax.f32 %v444_v45, 0.0 }
 0x132   :  { %v547_v49 = vmax.f32 %v447_v47, 0.0  ;;  %v1450_v50 = vpop.f32.mrb[20].mxu0 }
 0x133   :  { %v1451_v51 = vpop.f32.mrb[21].mxu0 }
 0x134   :  { %v1452_v52 = vadd.f32 %v1451_v51, %v1450_v50  ;;  %v1453_v53 = vpop.f32.mrb[22].mxu0  ;;  %v574_v54 = vpack.c.bf16 %v547_v49, %v546_v48 }
 0x135   :  { %v1454_v55 = vpop.f32.mrb[23].mxu0 }
 0x136   :  { %v452_v56 = vadd.f32 %v1452_v52, %v1934_v59  ;;  %v1455_v57 = vadd.f32 %v1454_v55, %v1453_v53  ;;  %1584 = vmatprep.mubr.bf16.mxu1 %v574_v54 }
 0x138   :  { %v455_v58 = vadd.f32 %v1455_v57, %v1934_v59  ;;  %v548_v60 = vmax.f32 %v452_v56, 0.0 }
 0x13a   :  { %v549_v61 = vmax.f32 %v455_v58, 0.0  ;;  %v1456_v62 = vpop.f32.mrb[24].mxu0 }
 0x13b   :  { %v1457_v63 = vpop.f32.mrb[25].mxu0 }
 0x13c   :  { %v1458_v0 = vadd.f32 %v1457_v63, %v1456_v62  ;;  %v1459_v1 = vpop.f32.mrb[26].mxu0  ;;  %v575_v2 = vpack.c.bf16 %v549_v61, %v548_v60 }
 0x13d   :  { %v1460_v3 = vpop.f32.mrb[27].mxu0 }
 0x13e   :  { %v460_v4 = vadd.f32 %v1458_v0, %v1934_v59  ;;  %v1461_v5 = vadd.f32 %v1460_v3, %v1459_v1  ;;  %1585 = vmatmul.mubr.bf16.gmra.mrb[8].mxu1 %v575_v2 }
 0x140   :  { %v463_v6 = vadd.f32 %v1461_v5, %v1934_v59  ;;  %v550_v7 = vmax.f32 %v460_v4, 0.0 }
 0x142   :  { %v551_v8 = vmax.f32 %v463_v6, 0.0  ;;  %v1462_v9 = vpop.f32.mrb[28].mxu0 }
 0x143   :  { %v1463_v10 = vpop.f32.mrb[29].mxu0 }
 0x144   :  { %v1464_v11 = vadd.f32 %v1463_v10, %v1462_v9  ;;  %v1465_v12 = vpop.f32.mrb[30].mxu0  ;;  %v576_v13 = vpack.c.bf16 %v551_v8, %v550_v7 }
 0x145   :  { %v1466_v14 = vpop.f32.mrb[31].mxu0 }
 0x146   :  { %v468_v15 = vadd.f32 %v1464_v11, %v1934_v59  ;;  %v1467_v16 = vadd.f32 %v1466_v14, %v1465_v12  ;;  %1588 = vmatprep.mubr.bf16.mxu1 %v576_v13  ;;  %v1730_v13 = vld [vmem:[%s2099_s5 + $0x10] sm:$0xff]  }
 0x147   :  { %1612 = vmatprep.subr.bf16.mxu1 %v1730_v13 }
 0x148   :  { %v471_v17 = vadd.f32 %v1467_v16, %v1934_v59  ;;  %v552_v18 = vmax.f32 %v468_v15, 0.0  ;;  %1613 = vmatpush3.bf16.msra.mxu1 %v1730_v13 }
 0x14a   :  { %v553_v19 = vmax.f32 %v471_v17, 0.0  ;;  %v1468_v20 = vpop.f32.mrb[32].mxu0 }
 0x14b   :  { %v1469_v21 = vpop.f32.mrb[33].mxu0 }
 0x14c   :  { %v1470_v22 = vadd.f32 %v1469_v21, %v1468_v20  ;;  %v1471_v23 = vpop.f32.mrb[34].mxu0  ;;  %v577_v24 = vpack.c.bf16 %v553_v19, %v552_v18  ;;  %v1731_v21 = vld [vmem:[%s2099_s5 + $0x18] sm:$0xff]  }
 0x14d   :  { %v1472_v25 = vpop.f32.mrb[35].mxu0  ;;  %1614 = vmatprep.subr.bf16.mxu1 %v1731_v21 }
 0x14e   :  { %v476_v26 = vadd.f32 %v1470_v22, %v1934_v59  ;;  %v1473_v27 = vadd.f32 %v1472_v25, %v1471_v23  ;;  %1589 = vmatmul.mubr.bf16.gmra.mrb[12].mxu1 %v577_v24 }
 0x14f   :  { %1615 = vmatpush3.bf16.msra.mxu1 %v1731_v21 }
 0x150   :  { %v479_v28 = vadd.f32 %v1473_v27, %v1934_v59  ;;  %v554_v29 = vmax.f32 %v476_v26, 0.0 }
 0x152   :  { %v555_v30 = vmax.f32 %v479_v28, 0.0  ;;  %v1474_v31 = vpop.f32.mrb[36].mxu0 }
 0x153   :  { %v1475_v32 = vpop.f32.mrb[37].mxu0 }
 0x154   :  { %v1476_v33 = vadd.f32 %v1475_v32, %v1474_v31  ;;  %v1477_v34 = vpop.f32.mrb[38].mxu0  ;;  %v578_v35 = vpack.c.bf16 %v555_v30, %v554_v29 }
 0x155   :  { %v1478_v36 = vpop.f32.mrb[39].mxu0 }
 0x156   :  { %v484_v37 = vadd.f32 %v1476_v33, %v1934_v59  ;;  %v1479_v38 = vadd.f32 %v1478_v36, %v1477_v34  ;;  %1592 = vmatprep.mubr.bf16.mxu1 %v578_v35 }
 0x158   :  { %v487_v39 = vadd.f32 %v1479_v38, %v1934_v59  ;;  %v556_v40 = vmax.f32 %v484_v37, 0.0 }
 0x15a   :  { %v557_v41 = vmax.f32 %v487_v39, 0.0  ;;  %v1480_v42 = vpop.f32.mrb[40].mxu0 }
 0x15b   :  { %v1481_v43 = vpop.f32.mrb[41].mxu0 }
 0x15c   :  { %v1482_v44 = vadd.f32 %v1481_v43, %v1480_v42  ;;  %v1483_v45 = vpop.f32.mrb[42].mxu0  ;;  %v579_v46 = vpack.c.bf16 %v557_v41, %v556_v40 }
 0x15d   :  { %v1484_v47 = vpop.f32.mrb[43].mxu0 }
 0x15e   :  { %v492_v48 = vadd.f32 %v1482_v44, %v1934_v59  ;;  %v1485_v49 = vadd.f32 %v1484_v47, %v1483_v45  ;;  %1593 = vmatmul.mubr.bf16.gmra.mrb[16].mxu1 %v579_v46 }
 0x160   :  { %v495_v50 = vadd.f32 %v1485_v49, %v1934_v59  ;;  %v558_v51 = vmax.f32 %v492_v48, 0.0  ;;  %v1149_v48 = vld [vmem:[%s2101_s7 + $0x10] sm:$0xff]  ;;  %v1791_v49 = vmov 0  }
 0x161   :  { %1655 = vset.pattern.permute.xlu1 %v1791_v49  ;;  %1654 = vset.pattern.permute.xlu0 %v1791_v49 }
 0x162   :  { %v559_v52 = vmax.f32 %v495_v50, 0.0  ;;  %v1486_v53 = vpop.f32.mrb[44].mxu0  ;;  %1228 = vperm.xlu1 %1655, %v1149_v48   ;;  %v1986_v50 = vld [vmem:[%s2098_s4] ss:$0 sm:$0xff] }
 0x163   :  { %v1487_v54 = vpop.f32.mrb[45].mxu0 }
 0x164   :  { %v1488_v55 = vadd.f32 %v1487_v54, %v1486_v53  ;;  %v1489_v56 = vpop.f32.mrb[46].mxu0  ;;  %v580_v57 = vpack.c.bf16 %v559_v52, %v558_v51 }
 0x165   :  { %v1490_v58 = vpop.f32.mrb[47].mxu0 }
 0x166   :  { %v500_v60 = vadd.f32 %v1488_v55, %v1934_v59  ;;  %v1491_v61 = vadd.f32 %v1490_v58, %v1489_v56  ;;  %1596 = vmatprep.mubr.bf16.mxu1 %v580_v57 }
 0x168   :  { %v503_v62 = vadd.f32 %v1491_v61, %v1934_v59  ;;  %v560_v63 = vmax.f32 %v500_v60, 0.0 }
 0x16a   :  { %v561_v0 = vmax.f32 %v503_v62, 0.0  ;;  %v1492_v1 = vpop.f32.mrb[48].mxu0 }
 0x16b   :  { %v1493_v2 = vpop.f32.mrb[49].mxu0 }
 0x16c   :  { %v1494_v3 = vadd.f32 %v1493_v2, %v1492_v1  ;;  %v1495_v4 = vpop.f32.mrb[50].mxu0  ;;  %v581_v5 = vpack.c.bf16 %v561_v0, %v560_v63 }
 0x16d   :  { %v1496_v6 = vpop.f32.mrb[51].mxu0 }
 0x16e   :  { %v508_v7 = vadd.f32 %v1494_v3, %v1934_v59  ;;  %v1497_v8 = vadd.f32 %v1496_v6, %v1495_v4  ;;  %1597 = vmatmul.mubr.bf16.gmra.mrb[20].mxu1 %v581_v5 }
 0x170   :  { %v511_v9 = vadd.f32 %v1497_v8, %v1934_v59  ;;  %v562_v10 = vmax.f32 %v508_v7, 0.0 }
 0x172   :  { %v563_v11 = vmax.f32 %v511_v9, 0.0  ;;  %v1498_v12 = vpop.f32.mrb[52].mxu0 }
 0x173   :  { %v1499_v14 = vpop.f32.mrb[53].mxu0 }
 0x174   :  { %v1500_v15 = vadd.f32 %v1499_v14, %v1498_v12  ;;  %v1501_v16 = vpop.f32.mrb[54].mxu0  ;;  %v582_v17 = vpack.c.bf16 %v563_v11, %v562_v10 }
 0x175   :  { %v1502_v18 = vpop.f32.mrb[55].mxu0 }
 0x176   :  { %v516_v19 = vadd.f32 %v1500_v15, %v1934_v59  ;;  %v1503_v20 = vadd.f32 %v1502_v18, %v1501_v16  ;;  %1600 = vmatprep.mubr.bf16.mxu1 %v582_v17 }
 0x178   :  { %v519_v22 = vadd.f32 %v1503_v20, %v1934_v59  ;;  %v564_v23 = vmax.f32 %v516_v19, 0.0 }
 0x17a   :  { %v565_v24 = vmax.f32 %v519_v22, 0.0  ;;  %v1504_v25 = vpop.f32.mrb[56].mxu0 }
 0x17b   :  { %v1505_v26 = vpop.f32.mrb[57].mxu0 }
 0x17c   :  { %v1506_v27 = vadd.f32 %v1505_v26, %v1504_v25  ;;  %v1507_v28 = vpop.f32.mrb[58].mxu0  ;;  %v583_v29 = vpack.c.bf16 %v565_v24, %v564_v23 }
 0x17d   :  { %v1508_v30 = vpop.f32.mrb[59].mxu0 }
 0x17e   :  { %v524_v31 = vadd.f32 %v1506_v27, %v1934_v59  ;;  %v1509_v32 = vadd.f32 %v1508_v30, %v1507_v28  ;;  %1601 = vmatmul.mubr.bf16.gmra.mrb[24].mxu1 %v583_v29 }
 0x180   :  { %v527_v33 = vadd.f32 %v1509_v32, %v1934_v59  ;;  %v566_v34 = vmax.f32 %v524_v31, 0.0 }
 0x182   :  { %v567_v35 = vmax.f32 %v527_v33, 0.0  ;;  %v1510_v36 = vpop.f32.mrb[60].mxu0 }
 0x183   :  { %v1511_v37 = vpop.f32.mrb[61].mxu0 }
 0x184   :  { %v1512_v38 = vadd.f32 %v1511_v37, %v1510_v36  ;;  %v1513_v39 = vpop.f32.mrb[62].mxu0  ;;  %v584_v40 = vpack.c.bf16 %v567_v35, %v566_v34 }
 0x185   :  { %v1514_v41 = vpop.f32.mrb[63].mxu0 }
 0x186   :  { %v532_v42 = vadd.f32 %v1512_v38, %v1934_v59  ;;  %v1515_v43 = vadd.f32 %v1514_v41, %v1513_v39  ;;  %1604 = vmatprep.mubr.bf16.mxu1 %v584_v40 }
 0x188   :  { %v535_v44 = vadd.f32 %v1515_v43, %v1934_v59  ;;  %v568_v45 = vmax.f32 %v532_v42, 0.0  ;;  %v1150_v59 = vld [vmem:[%s2101_s7 + $0x18] sm:$0xff] }
 0x189   :  { %1233 = vperm.xlu1 %1655, %v1150_v59  }
 0x18a   :  { %v569_v46 = vmax.f32 %v535_v44, 0.0 }
 0x18c   :  { %v585_v47 = vpack.c.bf16 %v569_v46, %v568_v45 }
 0x18e   :  { %1605 = vmatmul.mubr.bf16.gmra.mrb[28].mxu1 %v585_v47 }
 0x1f1   :  { %v1578_v51 = vpop.f32.mrb[0].mxu1 }
 0x1f2   :  { %v700_v52 = vadd.f32 %v1578_v51, %v1986_v50  ;;  %v691_v53 = vpop.f32.mrb[1].mxu1 }
 0x1f3   :  { %v692_v54 = vadd.f32 %v1986_v50, %v691_v53  ;;  %v1579_v55 = vpop.f32.mrb[2].mxu1 }
 0x1f4   :  { %v703_v56 = vadd.f32 %v1579_v55, %v1986_v50  ;;  %v694_v57 = vpop.f32.mrb[3].mxu1  ;;  %v820_v60 = vmax.f32 %v700_v52, 0.0 }
 0x1f5   :  { %v695_v58 = vadd.f32 %v1986_v50, %v694_v57  ;;  %v818_v62 = vmax.f32 %v692_v54, 0.0 }
 0x1f6   :  { %v821_v61 = vmax.f32 %v703_v56, 0.0 }
 0x1f7   :  { %v819_v63 = vmax.f32 %v695_v58, 0.0 }
 0x1f8   :  { %v851_v0 = vpack.c.bf16 %v821_v61, %v820_v60 }
 0x1f9   :  { %v850_v1 = vpack.c.bf16 %v819_v63, %v818_v62 }
 0x1fb   :  { %1616 = vmatprep.mubr.msk.bf16.mxu1 %vm905_vm0, %v850_v1 }
 0x1fc   :  { %1617 = vmatmul.mubr.msk.bf16.vlgmr.msra.gmra.mrb[32].mxu1 %vm905_vm0, %v851_v0 }
 0x201   :  { %v1582_v2 = vpop.f32.mrb[4].mxu1 }
 0x202   :  { %v716_v3 = vadd.f32 %v1582_v2, %v1986_v50  ;;  %v707_v4 = vpop.f32.mrb[5].mxu1 }
 0x203   :  { %v708_v5 = vadd.f32 %v1986_v50, %v707_v4  ;;  %v1583_v6 = vpop.f32.mrb[6].mxu1 }
 0x204   :  { %v719_v7 = vadd.f32 %v1583_v6, %v1986_v50  ;;  %v710_v8 = vpop.f32.mrb[7].mxu1  ;;  %v824_v10 = vmax.f32 %v716_v3, 0.0 }
 0x205   :  { %v711_v9 = vadd.f32 %v1986_v50, %v710_v8  ;;  %v822_v12 = vmax.f32 %v708_v5, 0.0 }
 0x206   :  { %v825_v11 = vmax.f32 %v719_v7, 0.0 }
 0x207   :  { %v823_v13 = vmax.f32 %v711_v9, 0.0 }
 0x208   :  { %v853_v14 = vpack.c.bf16 %v825_v11, %v824_v10 }
 0x209   :  { %v852_v15 = vpack.c.bf16 %v823_v13, %v822_v12 }
 0x20b   :  { %1620 = vmatprep.mubr.msk.bf16.mxu1 %vm905_vm0, %v852_v15 }
 0x20c   :  { %1621 = vmatmul.mubr.msk.bf16.gmra.mrb[36].mxu1 %vm905_vm0, %v853_v14 }
 0x211   :  { %v1586_v16 = vpop.f32.mrb[8].mxu1 }
 0x212   :  { %v732_v17 = vadd.f32 %v1586_v16, %v1986_v50  ;;  %v723_v18 = vpop.f32.mrb[9].mxu1 }
 0x213   :  { %v724_v19 = vadd.f32 %v1986_v50, %v723_v18  ;;  %v1587_v20 = vpop.f32.mrb[10].mxu1 }
 0x214   :  { %v735_v21 = vadd.f32 %v1587_v20, %v1986_v50  ;;  %v726_v22 = vpop.f32.mrb[11].mxu1  ;;  %v828_v24 = vmax.f32 %v732_v17, 0.0 }
 0x215   :  { %v727_v23 = vadd.f32 %v1986_v50, %v726_v22  ;;  %v826_v26 = vmax.f32 %v724_v19, 0.0 }
 0x216   :  { %v829_v25 = vmax.f32 %v735_v21, 0.0 }
 0x217   :  { %v827_v27 = vmax.f32 %v727_v23, 0.0  ;;  %v1147_v23 = vld [vmem:[%s2101_s7] sm:$0xff] }
 0x218   :  { %v855_v28 = vpack.c.bf16 %v829_v25, %v828_v24  ;;  %1218 = vperm.xlu0 %1654, %v1147_v23   ;;  %v1148_v24 = vld [vmem:[%s2101_s7 + $0x8] sm:$0xff] }
 0x219   :  { %v854_v29 = vpack.c.bf16 %v827_v27, %v826_v26 }
 0x21b   :  { %1624 = vmatprep.mubr.msk.bf16.mxu1 %vm905_vm0, %v854_v29 }
 0x21c   :  { %1625 = vmatmul.mubr.msk.bf16.gmra.mrb[40].mxu1 %vm905_vm0, %v855_v28  ;;  %1223 = vperm.xlu0 %1654, %v1148_v24  }
 0x221   :  { %v1590_v30 = vpop.f32.mrb[12].mxu1 }
 0x222   :  { %v748_v31 = vadd.f32 %v1590_v30, %v1986_v50  ;;  %v739_v32 = vpop.f32.mrb[13].mxu1 }
 0x223   :  { %v740_v33 = vadd.f32 %v1986_v50, %v739_v32  ;;  %v1591_v34 = vpop.f32.mrb[14].mxu1 }
 0x224   :  { %v751_v35 = vadd.f32 %v1591_v34, %v1986_v50  ;;  %v742_v36 = vpop.f32.mrb[15].mxu1  ;;  %v832_v38 = vmax.f32 %v748_v31, 0.0 }
 0x225   :  { %v743_v37 = vadd.f32 %v1986_v50, %v742_v36  ;;  %v830_v40 = vmax.f32 %v740_v33, 0.0 }
 0x226   :  { %v833_v39 = vmax.f32 %v751_v35, 0.0 }
 0x227   :  { %v831_v41 = vmax.f32 %v743_v37, 0.0 }
 0x228   :  { %v857_v42 = vpack.c.bf16 %v833_v39, %v832_v38  ;;  %v1151_v39 = vld [vmem:[#allocation2] sm:$0x1] }
 0x229   :  { %v856_v43 = vpack.c.bf16 %v831_v41, %v830_v40  ;;  %1264 = vperm.xlu0 %1654, %v1151_v39   ;;  %v2048_v40 = vld [vmem:[%s2100_s6] ss:$0 sm:$0xff]  ;;  %s1793_s6 = smov [#allocation6]  }
 0x22a   :  { %s1314_s19 = sshll.u32 %s1793_s6, 4  ;;  %s1315_s19 = int_to_ptr.vmem [resolvable:$true] %s1314_s19 }
 0x22b   :  { %1628 = vmatprep.mubr.msk.bf16.mxu1 %vm905_vm0, %v856_v43  ;;  %s1762_s8 = scalar_lea.vmem %s1315_s19, 32  ;;  %p1767_p9 = scmp.lt.s32.totalorder %s1315_s19, %s1315_s19 }
 0x22c   :  { %1629 = vmatmul.mubr.msk.bf16.gmra.mrb[44].mxu1 %vm905_vm0, %v857_v42  ;;  %p1763_p8 = scmp.ne.s32.totalorder %s1315_s19, %s1762_s8  ;;  %p1768_p10 = scmp.lt.s32.totalorder %s1762_s8, %s1762_s8 }
 0x22e   :  { %p1769_p11 = por %p1768_p10, %p1767_p9 }
 0x230   :  { %p1770_p12 = pnand %p1769_p11, %p1763_p8 }
 0x231   :  { %v1594_v44 = vpop.f32.mrb[16].mxu1 }
 0x232   :  { %v764_v45 = vadd.f32 %v1594_v44, %v1986_v50  ;;  %v755_v46 = vpop.f32.mrb[17].mxu1 }
 0x233   :  { %v756_v47 = vadd.f32 %v1986_v50, %v755_v46  ;;  %v1595_v48 = vpop.f32.mrb[18].mxu1 }
 0x234   :  { %v767_v49 = vadd.f32 %v1595_v48, %v1986_v50  ;;  %v758_v59 = vpop.f32.mrb[19].mxu1  ;;  %v836_v52 = vmax.f32 %v764_v45, 0.0 }
 0x235   :  { %v759_v51 = vadd.f32 %v1986_v50, %v758_v59  ;;  %v834_v54 = vmax.f32 %v756_v47, 0.0 }
 0x236   :  { %v837_v53 = vmax.f32 %v767_v49, 0.0 }
 0x237   :  { %v835_v55 = vmax.f32 %v759_v51, 0.0 }
 0x238   :  { %v859_v56 = vpack.c.bf16 %v837_v53, %v836_v52 }
 0x239   :  { %v858_v57 = vpack.c.bf16 %v835_v55, %v834_v54 }
 0x23b   :  { %1632 = vmatprep.mubr.msk.bf16.mxu1 %vm905_vm0, %v858_v57 }
 0x23c   :  { %1633 = vmatmul.mubr.msk.bf16.gmra.mrb[48].mxu1 %vm905_vm0, %v859_v56 }
 0x241   :  { %v1598_v58 = vpop.f32.mrb[20].mxu1 }
 0x242   :  { %v780_v60 = vadd.f32 %v1598_v58, %v1986_v50  ;;  %v771_v61 = vpop.f32.mrb[21].mxu1 }
 0x243   :  { %v772_v62 = vadd.f32 %v1986_v50, %v771_v61  ;;  %v1599_v63 = vpop.f32.mrb[22].mxu1 }
 0x244   :  { %v783_v0 = vadd.f32 %v1599_v63, %v1986_v50  ;;  %v774_v1 = vpop.f32.mrb[23].mxu1  ;;  %v840_v3 = vmax.f32 %v780_v60, 0.0 }
 0x245   :  { %v775_v2 = vadd.f32 %v1986_v50, %v774_v1  ;;  %v838_v5 = vmax.f32 %v772_v62, 0.0 }
 0x246   :  { %v841_v4 = vmax.f32 %v783_v0, 0.0 }
 0x247   :  { %v839_v6 = vmax.f32 %v775_v2, 0.0 }
 0x248   :  { %v861_v7 = vpack.c.bf16 %v841_v4, %v840_v3 }
 0x249   :  { %v860_v8 = vpack.c.bf16 %v839_v6, %v838_v5 }
 0x24b   :  { %1636 = vmatprep.mubr.msk.bf16.mxu1 %vm905_vm0, %v860_v8 }
 0x24c   :  { %1637 = vmatmul.mubr.msk.bf16.gmra.mrb[52].mxu1 %vm905_vm0, %v861_v7 }
 0x251   :  { %v1602_v9 = vpop.f32.mrb[24].mxu1 }
 0x252   :  { %v796_v10 = vadd.f32 %v1602_v9, %v1986_v50  ;;  %v787_v11 = vpop.f32.mrb[25].mxu1 }
 0x253   :  { %v788_v12 = vadd.f32 %v1986_v50, %v787_v11  ;;  %v1603_v13 = vpop.f32.mrb[26].mxu1 }
 0x254   :  { %v799_v14 = vadd.f32 %v1603_v13, %v1986_v50  ;;  %v790_v15 = vpop.f32.mrb[27].mxu1  ;;  %v844_v17 = vmax.f32 %v796_v10, 0.0 }
 0x255   :  { %v791_v16 = vadd.f32 %v1986_v50, %v790_v15  ;;  %v842_v19 = vmax.f32 %v788_v12, 0.0 }
 0x256   :  { %v845_v18 = vmax.f32 %v799_v14, 0.0 }
 0x257   :  { %v843_v20 = vmax.f32 %v791_v16, 0.0 }
 0x258   :  { %v863_v21 = vpack.c.bf16 %v845_v18, %v844_v17 }
 0x259   :  { %v862_v22 = vpack.c.bf16 %v843_v20, %v842_v19 }
 0x25b   :  { %1640 = vmatprep.mubr.msk.bf16.mxu1 %vm905_vm0, %v862_v22 }
 0x25c   :  { %1641 = vmatmul.mubr.msk.bf16.gmra.mrb[56].mxu1 %vm905_vm0, %v863_v21 }
 0x261   :  { %v1606_v25 = vpop.f32.mrb[28].mxu1 }
 0x262   :  { %v812_v26 = vadd.f32 %v1606_v25, %v1986_v50  ;;  %v803_v27 = vpop.f32.mrb[29].mxu1 }
 0x263   :  { %v804_v28 = vadd.f32 %v1986_v50, %v803_v27  ;;  %v1607_v29 = vpop.f32.mrb[30].mxu1 }
 0x264   :  { %v815_v30 = vadd.f32 %v1607_v29, %v1986_v50  ;;  %v806_v31 = vpop.f32.mrb[31].mxu1  ;;  %v848_v33 = vmax.f32 %v812_v26, 0.0 }
 0x265   :  { %v807_v32 = vadd.f32 %v1986_v50, %v806_v31  ;;  %v846_v35 = vmax.f32 %v804_v28, 0.0 }
 0x266   :  { %v849_v34 = vmax.f32 %v815_v30, 0.0 }
 0x267   :  { %v847_v36 = vmax.f32 %v807_v32, 0.0 }
 0x268   :  { %v865_v37 = vpack.c.bf16 %v849_v34, %v848_v33 }
 0x269   :  { %v864_v38 = vpack.c.bf16 %v847_v36, %v846_v35 }
 0x26b   :  { %1644 = vmatprep.mubr.msk.bf16.mxu1 %vm905_vm0, %v864_v38 }
 0x26c   :  { %1645 = vmatmul.mubr.msk.bf16.gmra.mrb[60].mxu1 %vm905_vm0, %v865_v37 }
 0x2cf   :  { %v1618_v41 = vpop.f32.mrb[32].mxu1 }
 0x2d0   :  { %v988_v42 = vpop.f32.mrb[33].mxu1  ;;  %v997_v47 = vadd.f32 %v1618_v41, %v2048_v40 }
 0x2d1   :  { %v989_v50 = vadd.f32 %v2048_v40, %v988_v42  ;;  %v1619_v43 = vpop.f32.mrb[34].mxu1 }
 0x2d2   :  { %v991_v44 = vpop.f32.mrb[35].mxu1  ;;  %v1117_v49 = vmax.f32 %v997_v47, 0.0  ;;  %v1000_v59 = vadd.f32 %v1619_v43, %v2048_v40 }
 0x2d3   :  { %v1115_v45 = vmax.f32 %v989_v50, 0.0  ;;  %v992_v46 = vadd.f32 %v2048_v40, %v991_v44 }
 0x2d4   :  { %v1118_v51 = vmax.f32 %v1000_v59, 0.0 }
 0x2d5   :  { %1152 = vxpose.xlu1.b32.start [1/16] (narrow) %v1115_v45, 32  ;;  %v1116_v48 = vmax.f32 %v992_v46, 0.0 }
 0x2d9   :  { %1153 = vxpose.xlu1.b32.cont [2/16] (narrow) %v1116_v48, 32 }
 0x2dd   :  { %1154 = vxpose.xlu1.b32.cont [3/16] (narrow) %v1117_v49, 32 }
 0x2df   :  { %v1622_v52 = vpop.f32.mrb[36].mxu1 }
 0x2e0   :  { %v1004_v53 = vpop.f32.mrb[37].mxu1  ;;  %v1013_v60 = vadd.f32 %v1622_v52, %v2048_v40 }
 0x2e1   :  { %v1005_v54 = vadd.f32 %v2048_v40, %v1004_v53  ;;  %v1623_v55 = vpop.f32.mrb[38].mxu1  ;;  %1155 = vxpose.xlu1.b32.cont [4/16] (narrow) %v1118_v51, 32 }
 0x2e2   :  { %v1007_v56 = vpop.f32.mrb[39].mxu1  ;;  %v1121_v62 = vmax.f32 %v1013_v60, 0.0  ;;  %v1016_v63 = vadd.f32 %v1623_v55, %v2048_v40 }
 0x2e3   :  { %v1119_v57 = vmax.f32 %v1005_v54, 0.0  ;;  %v1008_v58 = vadd.f32 %v2048_v40, %v1007_v56 }
 0x2e4   :  { %v1122_v0 = vmax.f32 %v1016_v63, 0.0 }
 0x2e5   :  { %1156 = vxpose.xlu1.b32.cont [5/16] (narrow) %v1119_v57, 32  ;;  %v1120_v61 = vmax.f32 %v1008_v58, 0.0 }
 0x2e9   :  { %1157 = vxpose.xlu1.b32.cont [6/16] (narrow) %v1120_v61, 32 }
 0x2ed   :  { %1158 = vxpose.xlu1.b32.cont [7/16] (narrow) %v1121_v62, 32 }
 0x2ef   :  { %v1626_v1 = vpop.f32.mrb[40].mxu1 }
 0x2f0   :  { %v1020_v2 = vpop.f32.mrb[41].mxu1  ;;  %v1029_v8 = vadd.f32 %v1626_v1, %v2048_v40 }
 0x2f1   :  { %v1021_v3 = vadd.f32 %v2048_v40, %v1020_v2  ;;  %v1627_v4 = vpop.f32.mrb[42].mxu1  ;;  %1159 = vxpose.xlu1.b32.cont [8/16] (narrow) %v1122_v0, 32 }
 0x2f2   :  { %v1023_v5 = vpop.f32.mrb[43].mxu1  ;;  %v1125_v10 = vmax.f32 %v1029_v8, 0.0  ;;  %v1032_v11 = vadd.f32 %v1627_v4, %v2048_v40 }
 0x2f3   :  { %v1123_v6 = vmax.f32 %v1021_v3, 0.0  ;;  %v1024_v7 = vadd.f32 %v2048_v40, %v1023_v5 }
 0x2f4   :  { %v1126_v12 = vmax.f32 %v1032_v11, 0.0 }
 0x2f5   :  { %1160 = vxpose.xlu1.b32.cont [9/16] (narrow) %v1123_v6, 32  ;;  %v1124_v9 = vmax.f32 %v1024_v7, 0.0 }
 0x2f9   :  { %1161 = vxpose.xlu1.b32.cont [10/16] (narrow) %v1124_v9, 32 }
 0x2fd   :  { %1162 = vxpose.xlu1.b32.cont [11/16] (narrow) %v1125_v10, 32  ;;  %v1229_v10 = vpop.permute.xlu1 %1228 }
 0x2ff   :  { %v1630_v13 = vpop.f32.mrb[44].mxu1 }
 0x300   :  { %v1036_v14 = vpop.f32.mrb[45].mxu1  ;;  %v1045_v20 = vadd.f32 %v1630_v13, %v2048_v40  ;;  %v1219_v13 = vpop.permute.xlu0 %1218 }
 0x301   :  { %v1037_v15 = vadd.f32 %v2048_v40, %v1036_v14  ;;  %v1631_v16 = vpop.f32.mrb[46].mxu1  ;;  %1163 = vxpose.xlu1.b32.cont [12/16] (narrow) %v1126_v12, 32  ;;  %v1234_v11 = vpop.permute.xlu1 %1233 }
 0x302   :  { %v1039_v17 = vpop.f32.mrb[47].mxu1  ;;  %v1129_v22 = vmax.f32 %v1045_v20, 0.0  ;;  %v1048_v23 = vadd.f32 %v1631_v16, %v2048_v40 }
 0x303   :  { %v1127_v18 = vmax.f32 %v1037_v15, 0.0  ;;  %v1040_v19 = vadd.f32 %v2048_v40, %v1039_v17 }
 0x304   :  { %v1130_v24 = vmax.f32 %v1048_v23, 0.0  ;;  %v1224_v15 = vpop.permute.xlu0 %1223 }
 0x305   :  { %1164 = vxpose.xlu1.b32.cont [13/16] (narrow) %v1127_v18, 32  ;;  %v1128_v21 = vmax.f32 %v1040_v19, 0.0 }
 0x309   :  { %1165 = vxpose.xlu1.b32.cont [14/16] (narrow) %v1128_v21, 32 }
 0x30d   :  { %1166 = vxpose.xlu1.b32.cont [15/16] (narrow) %v1129_v22, 32 }
 0x30f   :  { %v1634_v25 = vpop.f32.mrb[48].mxu1 }
 0x310   :  { %v1052_v26 = vpop.f32.mrb[49].mxu1  ;;  %v1061_v32 = vadd.f32 %v1634_v25, %v2048_v40 }
 0x311   :  { %v1053_v27 = vadd.f32 %v2048_v40, %v1052_v26  ;;  %v1635_v28 = vpop.f32.mrb[50].mxu1  ;;  %1167 = vxpose.xlu1.b32.end [16/16] (narrow) %v1130_v24, 32 }
 0x312   :  { %v1055_v29 = vpop.f32.mrb[51].mxu1  ;;  %v1133_v34 = vmax.f32 %v1061_v32, 0.0  ;;  %v1064_v35 = vadd.f32 %v1635_v28, %v2048_v40 }
 0x313   :  { %v1131_v30 = vmax.f32 %v1053_v27, 0.0  ;;  %v1056_v31 = vadd.f32 %v2048_v40, %v1055_v29  ;;  %v1267_v29 = vlaneseq }
 0x314   :  { %v1134_v36 = vmax.f32 %v1064_v35, 0.0 }
 0x315   :  { %1184 = vxpose.xlu0.b32.start [1/16] (narrow) %v1131_v30, 32  ;;  %v1132_v33 = vmax.f32 %v1056_v31, 0.0  ;;  %v1268_v32 = vshrl.u32 %v1267_v29, 7  ;;  %vm1305_vm1 = vcmp.lt.s32.totalorder %v1267_v29, 256 }
 0x319   :  { %1185 = vxpose.xlu0.b32.cont [2/16] (narrow) %v1132_v33, 32 }
 0x31d   :  { %1186 = vxpose.xlu0.b32.cont [3/16] (narrow) %v1133_v34, 32 }
 0x31f   :  { %v1638_v37 = vpop.f32.mrb[52].mxu1 }
 0x320   :  { %v1068_v38 = vpop.f32.mrb[53].mxu1  ;;  %v1077_v44 = vadd.f32 %v1638_v37, %v2048_v40 }
 0x321   :  { %v1069_v39 = vadd.f32 %v2048_v40, %v1068_v38  ;;  %v1639_v41 = vpop.f32.mrb[54].mxu1  ;;  %1187 = vxpose.xlu0.b32.cont [4/16] (narrow) %v1134_v36, 32  ;;  %v1269_v38 = vsub.s32 0, %v1268_v32 }
 0x322   :  { %v1071_v42 = vpop.f32.mrb[55].mxu1  ;;  %v1137_v46 = vmax.f32 %v1077_v44, 0.0  ;;  %v1080_v47 = vadd.f32 %v1639_v41, %v2048_v40 }
 0x323   :  { %v1135_v50 = vmax.f32 %v1069_v39, 0.0  ;;  %v1072_v43 = vadd.f32 %v2048_v40, %v1071_v42 }
 0x324   :  { %v1138_v48 = vmax.f32 %v1080_v47, 0.0 }
 0x325   :  { %1188 = vxpose.xlu0.b32.cont [5/16] (narrow) %v1135_v50, 32  ;;  %v1136_v45 = vmax.f32 %v1072_v43, 0.0 }
 0x329   :  { %1189 = vxpose.xlu0.b32.cont [6/16] (narrow) %v1136_v45, 32 }
 0x32d   :  { %1190 = vxpose.xlu0.b32.cont [7/16] (narrow) %v1137_v46, 32 }
 0x32f   :  { %v1642_v49 = vpop.f32.mrb[56].mxu1 }
 0x330   :  { %v1084_v59 = vpop.f32.mrb[57].mxu1  ;;  %v1093_v56 = vadd.f32 %v1642_v49, %v2048_v40 }
 0x331   :  { %v1085_v51 = vadd.f32 %v2048_v40, %v1084_v59  ;;  %v1643_v52 = vpop.f32.mrb[58].mxu1  ;;  %1191 = vxpose.xlu0.b32.cont [8/16] (narrow) %v1138_v48, 32 }
 0x332   :  { %v1087_v53 = vpop.f32.mrb[59].mxu1  ;;  %v1141_v58 = vmax.f32 %v1093_v56, 0.0  ;;  %v1096_v60 = vadd.f32 %v1643_v52, %v2048_v40 }
 0x333   :  { %v1139_v54 = vmax.f32 %v1085_v51, 0.0  ;;  %v1088_v55 = vadd.f32 %v2048_v40, %v1087_v53 }
 0x334   :  { %v1142_v61 = vmax.f32 %v1096_v60, 0.0 }
 0x335   :  { %1192 = vxpose.xlu0.b32.cont [9/16] (narrow) %v1139_v54, 32  ;;  %v1140_v57 = vmax.f32 %v1088_v55, 0.0 }
 0x339   :  { %1193 = vxpose.xlu0.b32.cont [10/16] (narrow) %v1140_v57, 32 }
 0x33d   :  { %1194 = vxpose.xlu0.b32.cont [11/16] (narrow) %v1141_v58, 32 }
 0x33f   :  { %v1646_v62 = vpop.f32.mrb[60].mxu1 }
 0x340   :  { %v1100_v63 = vpop.f32.mrb[61].mxu1  ;;  %v1109_v5 = vadd.f32 %v1646_v62, %v2048_v40 }
 0x341   :  { %v1101_v0 = vadd.f32 %v2048_v40, %v1100_v63  ;;  %v1647_v1 = vpop.f32.mrb[62].mxu1  ;;  %1195 = vxpose.xlu0.b32.cont [12/16] (narrow) %v1142_v61, 32  ;;  %v1792_v61 = vmov 1966171168  }
 0x342   :  { %v1103_v2 = vpop.f32.mrb[63].mxu1  ;;  %v1145_v7 = vmax.f32 %v1109_v5, 0.0  ;;  %v1112_v8 = vadd.f32 %v1647_v1, %v2048_v40  ;;  %v1289_v62 = vunpack.c.l.s4 %v1792_v61 }
 0x343   :  { %v1143_v3 = vmax.f32 %v1101_v0, 0.0  ;;  %v1104_v4 = vadd.f32 %v2048_v40, %v1103_v2  ;;  %v1265_v40 = vpop.permute.xlu0 %1264 }
 0x344   :  { %v1146_v9 = vmax.f32 %v1112_v8, 0.0  ;;  %v1270_v45 = vrot.slane %v1265_v40, %v1269_v38  ;;  %v1290_v63 = vunpack.c.0.s8 %v1289_v62 }
 0x345   :  { %1196 = vxpose.xlu0.b32.cont [13/16] (narrow) %v1143_v3, 32  ;;  %v1144_v6 = vmax.f32 %v1104_v4, 0.0 }
 0x346   :  { %v1293_v1 = vsub.s32 %v1290_v63, %v1268_v32 }
 0x349   :  { %1197 = vxpose.xlu0.b32.cont [14/16] (narrow) %v1144_v6, 32 }
 0x34d   :  { %1198 = vxpose.xlu0.b32.cont [15/16] (narrow) %v1145_v7, 32 }
 0x351   :  { %1199 = vxpose.xlu0.b32.end [16/16] (narrow) %v1146_v9, 32 }
 0x355   :  { %v1168_v12 = vpop.trf.xlu1 }
 0x356   :  { %v1236_v17 = vmul.f32 %v1219_v13, %v1168_v12 }
 0x359   :  { %v1169_v14 = vpop.trf.xlu1 }
 0x35a   :  { %v1238_v18 = vmul.f32 %v1224_v15, %v1169_v14 }
 0x35c   :  { %v1244_v19 = vadd.f32 %v1238_v18, %v1236_v17 }
 0x35d   :  { %v1170_v16 = vpop.trf.xlu1 }
 0x35e   :  { %v1240_v20 = vmul.f32 %v1229_v10, %v1170_v16 }
 0x360   :  { %v1245_v22 = vadd.f32 %v1244_v19, %v1240_v20 }
 0x361   :  { %v1171_v21 = vpop.trf.xlu1 }
 0x362   :  { %v1242_v23 = vmul.f32 %v1234_v11, %v1171_v21 }
 0x364   :  { %v1246_v24 = vadd.f32 %v1245_v22, %v1242_v23 }
 0x366   :  { %v1247_v25 = vrot.slane %v1246_v24, 4 }
 0x368   :  { %v1248_v26 = vadd.f32 %v1247_v25, %v1246_v24 }
 0x36a   :  { %v1249_v28 = vrot.slane %v1248_v26, 2 }
 0x36c   :  { %v1250_v33 = vadd.f32 %v1249_v28, %v1248_v26 }
 0x36e   :  { %v1251_v39 = vrot.slane %v1250_v33, 1 }
 0x370   :  { %v1252_v44 = vadd.f32 %v1251_v39, %v1250_v33 }
 0x372   :  { %v1271_v48 = vadd.f32 %v1270_v45, %v1252_v44 }
 0x374   :  { %v1402_v51 = vmul.f32 -1.442695, %v1271_v48 }
 0x376   :  { %1732 = vpow2.f32 %v1402_v51 }
 0x380   :  { %v1733_v56 = vpop.eup %1732 }
 0x381   :  { %v1279_v57 = vadd.f32 1.0, %v1733_v56 }
 0x395   :  { %v1200_v27 = vpop.trf.xlu0 }
 0x396   :  { %v1237_v35 = vmul.f32 %v1219_v13, %v1200_v27 }
 0x399   :  { %v1201_v30 = vpop.trf.xlu0 }
 0x39a   :  { %v1239_v31 = vmul.f32 %v1224_v15, %v1201_v30 }
 0x39c   :  { %v1253_v37 = vadd.f32 %v1239_v31, %v1237_v35 }
 0x39d   :  { %v1202_v34 = vpop.trf.xlu0 }
 0x39e   :  { %v1241_v36 = vmul.f32 %v1229_v10, %v1202_v34 }
 0x3a0   :  { %v1254_v42 = vadd.f32 %v1253_v37, %v1241_v36 }
 0x3a1   :  { %v1203_v41 = vpop.trf.xlu0 }
 0x3a2   :  { %v1243_v50 = vmul.f32 %v1234_v11, %v1203_v41 }
 0x3a4   :  { %v1255_v43 = vadd.f32 %v1254_v42, %v1243_v50 }
 0x3a6   :  { %v1256_v46 = vrot.slane %v1255_v43, 4 }
 0x3a8   :  { %v1257_v47 = vadd.f32 %v1256_v46, %v1255_v43 }
 0x3aa   :  { %v1258_v49 = vrot.slane %v1257_v47, 2 }
 0x3ac   :  { %v1259_v59 = vadd.f32 %v1258_v49, %v1257_v47 }
 0x3ae   :  { %v1260_v52 = vrot.slane %v1259_v59, 1 }
 0x3b0   :  { %v1261_v53 = vadd.f32 %v1260_v52, %v1259_v59 }
 0x3b2   :  { %v1272_v54 = vadd.f32 %v1270_v45, %v1261_v53 }
 0x3b4   :  { %v1403_v55 = vmul.f32 -1.442695, %v1272_v54 }
 0x3b6   :  { %1734 = vpow2.f32 %v1403_v55 }
 0x3b7   :  { %1736 = vrcp.f32 %v1279_v57 }
 0x3c0   :  { %v1735_v58 = vpop.eup %1734 }
 0x3c1   :  { %v1280_v60 = vadd.f32 1.0, %v1735_v58  ;;  %v1737_v0 = vpop.eup %1736 }
 0x3c3   :  { %1738 = vrcp.f32 %v1280_v60 }
 0x3cd   :  { %v1739_v2 = vpop.eup %1738 }
 0x3ce   :  { %v1287_v3 = vcombine.low %v1737_v0, %v1739_v2 }
 0x3d0   :  { %v1294_v4 = vrot.slane %v1287_v3, %v1293_v1 }
 0x3d2   :  { %v1301_v5 = vrot.slane %v1294_v4, %v1293_v1 }
 0x3d4   :  { %1307 = vst.msk [vmem:[#allocation6] sm:$0x3] %vm1305_vm1, %v1301_v5 }
 0x3d5   :  { %1773 = shalt.err (!%p1770_p12)
}
 0x3d6   :  { %s1774_s22 = scalar_lea.hbm %s2103_s9, 32 }
 0x3d7   :  { %p1775_p13 = scmp.ne.s32.totalorder %s2103_s9, %s1774_s22  ;;  %p1778_p0 = scmp.lt.u32.totalorder %s1774_s22, %s2103_s9 }
 0x3d9   :  { %p1780_p1 = pnand %p1778_p0, %p1775_p13 }
 0x3db   :  { %1783 = shalt.err (!%p1780_p1)
}
 0x3dc   :  { %1317 = dma.vmem_to_hbm [thread:$0]  %s1315_s19, 32, %s2103_s9, [#allocation5]  }
 0x3dd   :  { %1786 = dma.done.wait [#allocation5], 32  }
 0x3de   :  { %1787 = vsyncadd [#allocation5], 4294967264 }
 0x3df   :  { %1321 = vsyncpa [#allocation4], 1 }
 0x3e0   :  { %1322 = vsyncpa [#allocation5], 1 }

</bundles_post_ra>
